<compile_context>
chip_gen: v6e
topology: v6e:2x2x1
jax: 0.10.0
libtpu: 0.0.40
codegen_flags: <defaults>
</compile_context>

<pallas_src>
import jax
import jax.numpy as jnp
from jax.experimental import pallas as pl
from jax.experimental.pallas import tpu as pltpu


def _round_up(n, m):
    return ((n + m - 1) // m) * m


def _pick_tile(n, unit, max_tile):
    """Tile size: a multiple of `unit`, capped at `max_tile`, chosen so the grid
    has >=2 steps whenever there is more than one unit of real work (so both
    TensorCores are used on v7x under dimension_semantics=('parallel',))."""
    if n <= unit:
        return unit
    return min(max_tile, _round_up((n + 1) // 2, unit))


# ---------------------------------------------------------------------------
# Fused Conv2d(valid, stride 1) + bias + ReLU + MaxPool2d(2, 2)
# ---------------------------------------------------------------------------
def _conv_pool_kernel(w_ref, b_ref, p_ref, o_ref):
    t = o_ref.shape[-1]
    # Single MXU matmul over the 4 pool phases stacked along the lane axis.
    z = jnp.dot(w_ref[...], p_ref[...], preferred_element_type=jnp.float32)
    # 4-way max over lane-contiguous phase slices (max/ReLU/bias commute).
    z = jnp.maximum(jnp.maximum(z[:, 0 * t:1 * t], z[:, 1 * t:2 * t]),
                    jnp.maximum(z[:, 2 * t:3 * t], z[:, 3 * t:4 * t]))
    o_ref[...] = jnp.maximum(z + b_ref[...], 0.0).astype(o_ref.dtype)


def _conv_relu_pool(x_cm, w_mat, b_col, KH=5, KW=5):
    """x_cm:  (Cin, B, H, W) channel-major activation (f32 or bf16).
    w_mat: (Cout, Cin*KH*KW) bf16, rows flattened (ci, kh, kw) like torch.
    b_col: (Cout, 1) f32.
    Returns the pooled feature map (Cout, B, Hp, Wp) in bf16, channel-major."""
    Cin, B, H, W = x_cm.shape
    Cout, K = w_mat.shape
    assert K == Cin * KH * KW
    Hp, Wp = (H - KH + 1) // 2, (W - KW + 1) // 2
    M = B * Hp * Wp

    tile_m = _pick_tile(M, 128, 2048)
    M_pad = _round_up(M, tile_m)
    nt = M_pad // tile_m

    # TODO(synk): build the pool-phase patches inside the kernel from a raw
    # VMEM-resident input tile (per-image input is only a few KB); for now the
    # im2col stays wrapper-side, but in bf16, channel-major and transpose-free.
    xb = x_cm.astype(jnp.bfloat16)
    phases = []
    for dr in range(2):
        for dc in range(2):
            slabs = []
            for kh in range(KH):
                for kw in range(KW):
                    r0, c0 = dr + kh, dc + kw
                    slabs.append(xb[:, :, r0:r0 + 2 * Hp - 1:2,
                                         c0:c0 + 2 * Wp - 1:2])   # (Cin, B, Hp, Wp)
            p = jnp.stack(slabs, axis=1).reshape(K, M)   # rows (ci,kh,kw), cols (b,rp,cp)
            if M_pad != M:
                p = jnp.pad(p, ((0, 0), (0, M_pad - M)))
            phases.append(p)
    # Interleave the 4 phases per output tile along the lane/M axis -> one
    # (K, 4*tile_m) RHS slab (single DMA stream + single matmul) per grid step.
    rhs = jnp.stack(phases, axis=0).reshape(4, K, nt, tile_m)
    rhs = rhs.transpose(1, 2, 0, 3).reshape(K, nt * 4 * tile_m)

    y = pl.pallas_call(
        _conv_pool_kernel,
        out_shape=jax.ShapeDtypeStruct((Cout, M_pad), jnp.bfloat16),
        grid=(nt,),
        in_specs=[pl.BlockSpec((Cout, K), lambda i: (0, 0)),         # weights (VMEM-resident)
                  pl.BlockSpec((Cout, 1), lambda i: (0, 0)),         # bias
                  pl.BlockSpec((K, 4 * tile_m), lambda i: (0, i))],  # 4-phase patch tile
        out_specs=pl.BlockSpec((Cout, tile_m), lambda i: (0, i)),
        compiler_params=pltpu.CompilerParams(
            dimension_semantics=("parallel",),
            vmem_limit_bytes=32 * 1024 * 1024),
    )(w_mat, b_col, rhs)
    return y[:, :M].reshape(Cout, B, Hp, Wp)        # channel-major, no transpose


# ---------------------------------------------------------------------------
# Fused FC stack: fc1 + ReLU -> fc2 + ReLU -> fc3   (hidden dims padded to 128)
# ---------------------------------------------------------------------------
def _fc_stack_kernel(x_ref, w1_ref, b1_ref, w2_ref, b2_ref, w3_ref, b3_ref, o_ref):
    h = jnp.dot(x_ref[...], w1_ref[...], preferred_element_type=jnp.float32)
    h = jnp.maximum(h + b1_ref[...], 0.0).astype(jnp.bfloat16)
    h = jnp.dot(h, w2_ref[...], preferred_element_type=jnp.float32)
    h = jnp.maximum(h + b2_ref[...], 0.0).astype(jnp.bfloat16)
    o_ref[...] = jnp.dot(h, w3_ref[...], preferred_element_type=jnp.float32) + b3_ref[...]


def _fc_stack(x, w1, b1, w2, b2, w3, b3):
    """x: (B, 400) bf16 -> logits (B, 10) f32.  Weights are (K, 128) bf16 with
    zero padding beyond the true fan-out; biases (1, 128) f32 (zero-padded)."""
    B, K = x.shape
    Npad = w3.shape[1]
    tile_b = _pick_tile(B, 8, 512)
    B_pad = _round_up(B, tile_b)
    xp = x if x.dtype == jnp.bfloat16 else x.astype(jnp.bfloat16)
    if B_pad != B:
        xp = jnp.pad(xp, ((0, B_pad - B), (0, 0)))

    def full(shape):
        return pl.BlockSpec(shape, lambda i: (0, 0))

    y = pl.pallas_call(
        _fc_stack_kernel,
        out_shape=jax.ShapeDtypeStruct((B_pad, Npad), jnp.float32),
        grid=(B_pad // tile_b,),
        in_specs=[pl.BlockSpec((tile_b, K), lambda i: (i, 0)),
                  full(w1.shape), full(b1.shape),
                  full(w2.shape), full(b2.shape),
                  full(w3.shape), full(b3.shape)],
        out_specs=pl.BlockSpec((tile_b, Npad), lambda i: (i, 0)),
        compiler_params=pltpu.CompilerParams(
            dimension_semantics=("parallel",),
            vmem_limit_bytes=32 * 1024 * 1024),
    )(xp, w1, b1, w2, b2, w3, b3)
    return y[:B, :10]


# ---------------------------------------------------------------------------
# Parameters (torch-default-style uniform init) in kernel-ready layouts:
#   conv weights (Cout, Cin*25) bf16 (conv1 Cout padded 6->8, conv2 Cin padded
#   6->8 with zeros), FC weights pre-transposed and zero-padded to 128 lanes.
# ---------------------------------------------------------------------------
def init_params(seed=0):
    key = jax.random.PRNGKey(seed)
    keys = jax.random.split(key, 10)

    def uni(k, shape, fan_in):
        bound = 1.0 / jnp.sqrt(jnp.float32(fan_in))
        return jax.random.uniform(k, shape, jnp.float32, -bound, bound)

    conv1_w = uni(keys[0], (6, 3, 5, 5), 75)
    conv1_b = uni(keys[1], (6,), 75)
    conv2_w = uni(keys[2], (16, 6, 5, 5), 150)
    conv2_b = uni(keys[3], (16,), 150)
    fc1_w = uni(keys[4], (120, 400), 400)
    fc1_b = uni(keys[5], (120,), 400)
    fc2_w = uni(keys[6], (84, 120), 120)
    fc2_b = uni(keys[7], (84,), 120)
    fc3_w = uni(keys[8], (10, 84), 84)
    fc3_b = uni(keys[9], (10,), 84)

    # conv1: pad Cout 6 -> 8 (zero rows -> output channels 6,7 are exactly 0).
    c1w = jnp.zeros((8, 75), jnp.float32).at[:6].set(conv1_w.reshape(6, 75))
    c1b = jnp.zeros((8, 1), jnp.float32).at[:6, 0].set(conv1_b)
    # conv2: pad Cin 6 -> 8 with zero weight columns (matches padded conv1 out).
    c2w = jnp.zeros((16, 8, 5, 5), jnp.float32).at[:, :6].set(conv2_w).reshape(16, 200)
    c2b = conv2_b.reshape(16, 1)
    # FC: transpose to (K, N) and zero-pad hidden dims 120/84 -> 128.
    w1 = jnp.zeros((400, 128), jnp.float32).at[:, :120].set(fc1_w.T)
    b1 = jnp.zeros((1, 128), jnp.float32).at[0, :120].set(fc1_b)
    w2 = jnp.zeros((128, 128), jnp.float32).at[:120, :84].set(fc2_w.T)
    b2 = jnp.zeros((1, 128), jnp.float32).at[0, :84].set(fc2_b)
    w3 = jnp.zeros((128, 128), jnp.float32).at[:84, :10].set(fc3_w.T)
    b3 = jnp.zeros((1, 128), jnp.float32).at[0, :10].set(fc3_b)

    return {
        "conv1_w": c1w.astype(jnp.bfloat16), "conv1_b": c1b,
        "conv2_w": c2w.astype(jnp.bfloat16), "conv2_b": c2b,
        "fc1_w": w1.astype(jnp.bfloat16), "fc1_b": b1,
        "fc2_w": w2.astype(jnp.bfloat16), "fc2_b": b2,
        "fc3_w": w3.astype(jnp.bfloat16), "fc3_b": b3,
    }


# ---------------------------------------------------------------------------
# Forward pass (mirrors Net.forward)
# ---------------------------------------------------------------------------
def net_forward(params, x):
    # x: (B, 3, 32, 32) NCHW f32 -> channel-major once at the entry.
    x_cm = jnp.transpose(x, (1, 0, 2, 3))                               # (3, B, 32, 32)
    x_cm = _conv_relu_pool(x_cm, params["conv1_w"], params["conv1_b"])  # (8, B, 14, 14) bf16
    x_cm = _conv_relu_pool(x_cm, params["conv2_w"], params["conv2_b"])  # (16, B, 5, 5) bf16
    B = x_cm.shape[1]
    feats = jnp.transpose(x_cm, (1, 0, 2, 3)).reshape(B, 400)           # (B, 400) (c,h,w) order
    return _fc_stack(feats, params["fc1_w"], params["fc1_b"],
                     params["fc2_w"], params["fc2_b"],
                     params["fc3_w"], params["fc3_b"])                  # (B, 10)


if __name__ == "__main__":
    params = init_params(seed=0)
    x = jax.random.normal(jax.random.PRNGKey(0), (2, 3, 32, 32), jnp.float32)
    out = jax.jit(net_forward)(params, x)
    out = jax.block_until_ready(out)
    assert out.shape == (2, 10), out.shape
    assert bool(jnp.all(jnp.isfinite(out))), "non-finite logits"
    print("KERNEL_OK")
</pallas_src>

<mosaic_0001>
module attributes {stable_mosaic.version = 11 : i64} {
  func.func @_conv_pool_kernel(%arg0: i32, %arg1: memref<8x75xbf16, #tpu.memory_space<vmem>>, %arg2: memref<8x1xf32, #tpu.memory_space<vmem>>, %arg3: memref<75x1024xbf16, #tpu.memory_space<vmem>>, %arg4: memref<8x256xbf16, #tpu.memory_space<vmem>>) attributes {dimension_semantics = [#tpu.dimension_semantics<parallel>], iteration_bounds = array<i64: 2>, scalar_prefetch = 0 : i64, scratch_operands = 0 : i64, tpu.core_type = #tpu.core_type<tc>, window_params = [{pipeline_mode = #tpu.pipeline_mode<synchronous>, transform_indices = @transform_0, window_bounds = array<i64: 8, 75>}, {pipeline_mode = #tpu.pipeline_mode<synchronous>, transform_indices = @transform_1, window_bounds = array<i64: 8, 1>}, {transform_indices = @transform_2, window_bounds = array<i64: 75, 1024>}, {transform_indices = @transform_3, window_bounds = array<i64: 8, 256>}]} {
    %c0 = arith.constant 0 : index
    %c0_0 = arith.constant 0 : index
    %0 = vector.load %arg1[%c0, %c0_0] : memref<8x75xbf16, #tpu.memory_space<vmem>>, vector<8x75xbf16>
    %c0_1 = arith.constant 0 : index
    %c0_2 = arith.constant 0 : index
    %1 = vector.load %arg3[%c0_1, %c0_2] : memref<75x1024xbf16, #tpu.memory_space<vmem>>, vector<75x1024xbf16>
    %cst = arith.constant dense<0.000000e+00> : vector<8x1024xf32>
    %2 = tpu.matmul %0, %1, %cst {dimension_numbers = #tpu.dot_dimension_numbers<[1], [0], [0], [1], [0, 0, 1, 1], [], []>} : vector<8x75xbf16>, vector<75x1024xbf16>, vector<8x1024xf32> -> vector<8x1024xf32>
    %3 = vector.extract_strided_slice %2 {offsets = [0, 0], sizes = [8, 256], strides = [1, 1]} : vector<8x1024xf32> to vector<8x256xf32>
    %4 = vector.extract_strided_slice %2 {offsets = [0, 256], sizes = [8, 256], strides = [1, 1]} : vector<8x1024xf32> to vector<8x256xf32>
    %5 = arith.maximumf %3, %4 : vector<8x256xf32>
    %6 = vector.extract_strided_slice %2 {offsets = [0, 512], sizes = [8, 256], strides = [1, 1]} : vector<8x1024xf32> to vector<8x256xf32>
    %7 = vector.extract_strided_slice %2 {offsets = [0, 768], sizes = [8, 256], strides = [1, 1]} : vector<8x1024xf32> to vector<8x256xf32>
    %8 = arith.maximumf %6, %7 : vector<8x256xf32>
    %9 = arith.maximumf %5, %8 : vector<8x256xf32>
    %c0_3 = arith.constant 0 : index
    %c0_4 = arith.constant 0 : index
    %10 = vector.load %arg2[%c0_3, %c0_4] : memref<8x1xf32, #tpu.memory_space<vmem>>, vector<8x1xf32>
    %11 = vector.broadcast %10 : vector<8x1xf32> to vector<8x256xf32>
    %12 = arith.addf %9, %11 : vector<8x256xf32>
    %cst_5 = arith.constant 0.000000e+00 : f32
    %13 = vector.broadcast %cst_5 : f32 to vector<8x256xf32>
    %14 = arith.maximumf %12, %13 : vector<8x256xf32>
    %15 = arith.truncf %14 : vector<8x256xf32> to vector<8x256xbf16>
    %c0_6 = arith.constant 0 : index
    %c0_7 = arith.constant 0 : index
    %16 = vector.load %arg4[%c0_6, %c0_7] : memref<8x256xbf16, #tpu.memory_space<vmem>>, vector<8x256xbf16>
    tpu.vector_store %arg4[%c0_6, %c0_7], %15 {strides = array<i32>} : memref<8x256xbf16, #tpu.memory_space<vmem>>, vector<8x256xbf16>,
    return
  }
  func.func @transform_0(%arg0: i32) -> (i32, i32) {
    %c0_i32 = arith.constant 0 : i32
    %c0_i32_0 = arith.constant 0 : i32
    %c0_i32_1 = arith.constant 0 : i32
    return %c0_i32, %c0_i32_0 : i32, i32
  }
  func.func @transform_1(%arg0: i32) -> (i32, i32) {
    %c0_i32 = arith.constant 0 : i32
    %c0_i32_0 = arith.constant 0 : i32
    %c0_i32_1 = arith.constant 0 : i32
    return %c0_i32, %c0_i32_0 : i32, i32
  }
  func.func @transform_2(%arg0: i32) -> (i32, i32) {
    %c0_i32 = arith.constant 0 : i32
    %c0_i32_0 = arith.constant 0 : i32
    return %c0_i32, %arg0 : i32, i32
  }
  func.func @transform_3(%arg0: i32) -> (i32, i32) {
    %c0_i32 = arith.constant 0 : i32
    %c0_i32_0 = arith.constant 0 : i32
    return %c0_i32, %arg0 : i32, i32
  }
}

module attributes {stable_mosaic.version = 11 : i64} {
  func.func @_conv_pool_kernel(%arg0: i32, %arg1: memref<16x200xbf16, #tpu.memory_space<vmem>>, %arg2: memref<16x1xf32, #tpu.memory_space<vmem>>, %arg3: memref<200x512xbf16, #tpu.memory_space<vmem>>, %arg4: memref<16x128xbf16, #tpu.memory_space<vmem>>) attributes {dimension_semantics = [#tpu.dimension_semantics<parallel>], iteration_bounds = array<i64: 1>, scalar_prefetch = 0 : i64, scratch_operands = 0 : i64, tpu.core_type = #tpu.core_type<tc>, window_params = [{pipeline_mode = #tpu.pipeline_mode<synchronous>, transform_indices = @transform_0, window_bounds = array<i64: 16, 200>}, {pipeline_mode = #tpu.pipeline_mode<synchronous>, transform_indices = @transform_1, window_bounds = array<i64: 16, 1>}, {transform_indices = @transform_2, window_bounds = array<i64: 200, 512>}, {transform_indices = @transform_3, window_bounds = array<i64: 16, 128>}]} {
    %c0 = arith.constant 0 : index
    %c0_0 = arith.constant 0 : index
    %0 = vector.load %arg1[%c0, %c0_0] : memref<16x200xbf16, #tpu.memory_space<vmem>>, vector<16x200xbf16>
    %c0_1 = arith.constant 0 : index
    %c0_2 = arith.constant 0 : index
    %1 = vector.load %arg3[%c0_1, %c0_2] : memref<200x512xbf16, #tpu.memory_space<vmem>>, vector<200x512xbf16>
    %cst = arith.constant dense<0.000000e+00> : vector<16x512xf32>
    %2 = tpu.matmul %0, %1, %cst {dimension_numbers = #tpu.dot_dimension_numbers<[1], [0], [0], [1], [0, 0, 1, 1], [], []>} : vector<16x200xbf16>, vector<200x512xbf16>, vector<16x512xf32> -> vector<16x512xf32>
    %3 = vector.extract_strided_slice %2 {offsets = [0, 0], sizes = [16, 128], strides = [1, 1]} : vector<16x512xf32> to vector<16x128xf32>
    %4 = vector.extract_strided_slice %2 {offsets = [0, 128], sizes = [16, 128], strides = [1, 1]} : vector<16x512xf32> to vector<16x128xf32>
    %5 = arith.maximumf %3, %4 : vector<16x128xf32>
    %6 = vector.extract_strided_slice %2 {offsets = [0, 256], sizes = [16, 128], strides = [1, 1]} : vector<16x512xf32> to vector<16x128xf32>
    %7 = vector.extract_strided_slice %2 {offsets = [0, 384], sizes = [16, 128], strides = [1, 1]} : vector<16x512xf32> to vector<16x128xf32>
    %8 = arith.maximumf %6, %7 : vector<16x128xf32>
    %9 = arith.maximumf %5, %8 : vector<16x128xf32>
    %c0_3 = arith.constant 0 : index
    %c0_4 = arith.constant 0 : index
    %10 = vector.load %arg2[%c0_3, %c0_4] : memref<16x1xf32, #tpu.memory_space<vmem>>, vector<16x1xf32>
    %11 = vector.broadcast %10 : vector<16x1xf32> to vector<16x128xf32>
    %12 = arith.addf %9, %11 : vector<16x128xf32>
    %cst_5 = arith.constant 0.000000e+00 : f32
    %13 = vector.broadcast %cst_5 : f32 to vector<16x128xf32>
    %14 = arith.maximumf %12, %13 : vector<16x128xf32>
    %15 = arith.truncf %14 : vector<16x128xf32> to vector<16x128xbf16>
    %c0_6 = arith.constant 0 : index
    %c0_7 = arith.constant 0 : index
    %16 = vector.load %arg4[%c0_6, %c0_7] : memref<16x128xbf16, #tpu.memory_space<vmem>>, vector<16x128xbf16>
    tpu.vector_store %arg4[%c0_6, %c0_7], %15 {strides = array<i32>} : memref<16x128xbf16, #tpu.memory_space<vmem>>, vector<16x128xbf16>,
    return
  }
  func.func @transform_0(%arg0: i32) -> (i32, i32) {
    %c0_i32 = arith.constant 0 : i32
    %c0_i32_0 = arith.constant 0 : i32
    %c0_i32_1 = arith.constant 0 : i32
    return %c0_i32, %c0_i32_0 : i32, i32
  }
  func.func @transform_1(%arg0: i32) -> (i32, i32) {
    %c0_i32 = arith.constant 0 : i32
    %c0_i32_0 = arith.constant 0 : i32
    %c0_i32_1 = arith.constant 0 : i32
    return %c0_i32, %c0_i32_0 : i32, i32
  }
  func.func @transform_2(%arg0: i32) -> (i32, i32) {
    %c0_i32 = arith.constant 0 : i32
    %c0_i32_0 = arith.constant 0 : i32
    return %c0_i32, %arg0 : i32, i32
  }
  func.func @transform_3(%arg0: i32) -> (i32, i32) {
    %c0_i32 = arith.constant 0 : i32
    %c0_i32_0 = arith.constant 0 : i32
    return %c0_i32, %arg0 : i32, i32
  }
}

module attributes {stable_mosaic.version = 11 : i64} {
  func.func @_fc_stack_kernel(%arg0: i32, %arg1: memref<8x400xbf16, #tpu.memory_space<vmem>>, %arg2: memref<400x128xbf16, #tpu.memory_space<vmem>>, %arg3: memref<1x128xf32, #tpu.memory_space<vmem>>, %arg4: memref<128x128xbf16, #tpu.memory_space<vmem>>, %arg5: memref<1x128xf32, #tpu.memory_space<vmem>>, %arg6: memref<128x128xbf16, #tpu.memory_space<vmem>>, %arg7: memref<1x128xf32, #tpu.memory_space<vmem>>, %arg8: memref<8x128xf32, #tpu.memory_space<vmem>>) attributes {dimension_semantics = [#tpu.dimension_semantics<parallel>], iteration_bounds = array<i64: 1>, scalar_prefetch = 0 : i64, scratch_operands = 0 : i64, tpu.core_type = #tpu.core_type<tc>, window_params = [{transform_indices = @transform_0, window_bounds = array<i64: 8, 400>}, {pipeline_mode = #tpu.pipeline_mode<synchronous>, transform_indices = @transform_1, window_bounds = array<i64: 400, 128>}, {pipeline_mode = #tpu.pipeline_mode<synchronous>, transform_indices = @transform_2, window_bounds = array<i64: 1, 128>}, {pipeline_mode = #tpu.pipeline_mode<synchronous>, transform_indices = @transform_3, window_bounds = array<i64: 128, 128>}, {pipeline_mode = #tpu.pipeline_mode<synchronous>, transform_indices = @transform_4, window_bounds = array<i64: 1, 128>}, {pipeline_mode = #tpu.pipeline_mode<synchronous>, transform_indices = @transform_5, window_bounds = array<i64: 128, 128>}, {pipeline_mode = #tpu.pipeline_mode<synchronous>, transform_indices = @transform_6, window_bounds = array<i64: 1, 128>}, {transform_indices = @transform_7, window_bounds = array<i64: 8, 128>}]} {
    %c0 = arith.constant 0 : index
    %c0_0 = arith.constant 0 : index
    %0 = vector.load %arg1[%c0, %c0_0] : memref<8x400xbf16, #tpu.memory_space<vmem>>, vector<8x400xbf16>
    %c0_1 = arith.constant 0 : index
    %c0_2 = arith.constant 0 : index
    %1 = vector.load %arg2[%c0_1, %c0_2] : memref<400x128xbf16, #tpu.memory_space<vmem>>, vector<400x128xbf16>
    %cst = arith.constant dense<0.000000e+00> : vector<8x128xf32>
    %2 = tpu.matmul %0, %1, %cst {dimension_numbers = #tpu.dot_dimension_numbers<[1], [0], [0], [1], [0, 0, 1, 1], [], []>} : vector<8x400xbf16>, vector<400x128xbf16>, vector<8x128xf32> -> vector<8x128xf32>
    %c0_3 = arith.constant 0 : index
    %c0_4 = arith.constant 0 : index
    %3 = vector.load %arg3[%c0_3, %c0_4] : memref<1x128xf32, #tpu.memory_space<vmem>>, vector<1x128xf32>
    %4 = vector.broadcast %3 : vector<1x128xf32> to vector<8x128xf32>
    %5 = arith.addf %2, %4 : vector<8x128xf32>
    %cst_5 = arith.constant 0.000000e+00 : f32
    %6 = vector.broadcast %cst_5 : f32 to vector<8x128xf32>
    %7 = arith.maximumf %5, %6 : vector<8x128xf32>
    %8 = arith.truncf %7 : vector<8x128xf32> to vector<8x128xbf16>
    %c0_6 = arith.constant 0 : index
    %c0_7 = arith.constant 0 : index
    %9 = vector.load %arg4[%c0_6, %c0_7] : memref<128x128xbf16, #tpu.memory_space<vmem>>, vector<128x128xbf16>
    %cst_8 = arith.constant dense<0.000000e+00> : vector<8x128xf32>
    %10 = tpu.matmul %8, %9, %cst_8 {dimension_numbers = #tpu.dot_dimension_numbers<[1], [0], [0], [1], [0, 0, 1, 1], [], []>} : vector<8x128xbf16>, vector<128x128xbf16>, vector<8x128xf32> -> vector<8x128xf32>
    %c0_9 = arith.constant 0 : index
    %c0_10 = arith.constant 0 : index
    %11 = vector.load %arg5[%c0_9, %c0_10] : memref<1x128xf32, #tpu.memory_space<vmem>>, vector<1x128xf32>
    %12 = vector.broadcast %11 : vector<1x128xf32> to vector<8x128xf32>
    %13 = arith.addf %10, %12 : vector<8x128xf32>
    %cst_11 = arith.constant 0.000000e+00 : f32
    %14 = vector.broadcast %cst_11 : f32 to vector<8x128xf32>
    %15 = arith.maximumf %13, %14 : vector<8x128xf32>
    %16 = arith.truncf %15 : vector<8x128xf32> to vector<8x128xbf16>
    %c0_12 = arith.constant 0 : index
    %c0_13 = arith.constant 0 : index
    %17 = vector.load %arg6[%c0_12, %c0_13] : memref<128x128xbf16, #tpu.memory_space<vmem>>, vector<128x128xbf16>
    %cst_14 = arith.constant dense<0.000000e+00> : vector<8x128xf32>
    %18 = tpu.matmul %16, %17, %cst_14 {dimension_numbers = #tpu.dot_dimension_numbers<[1], [0], [0], [1], [0, 0, 1, 1], [], []>} : vector<8x128xbf16>, vector<128x128xbf16>, vector<8x128xf32> -> vector<8x128xf32>
    %c0_15 = arith.constant 0 : index
    %c0_16 = arith.constant 0 : index
    %19 = vector.load %arg7[%c0_15, %c0_16] : memref<1x128xf32, #tpu.memory_space<vmem>>, vector<1x128xf32>
    %20 = vector.broadcast %19 : vector<1x128xf32> to vector<8x128xf32>
    %21 = arith.addf %18, %20 : vector<8x128xf32>
    %c0_17 = arith.constant 0 : index
    %c0_18 = arith.constant 0 : index
    %22 = vector.load %arg8[%c0_17, %c0_18] : memref<8x128xf32, #tpu.memory_space<vmem>>, vector<8x128xf32>
    tpu.vector_store %arg8[%c0_17, %c0_18], %21 {strides = array<i32>} : memref<8x128xf32, #tpu.memory_space<vmem>>, vector<8x128xf32>,
    return
  }
  func.func @transform_0(%arg0: i32) -> (i32, i32) {
    %c0_i32 = arith.constant 0 : i32
    %c0_i32_0 = arith.constant 0 : i32
    return %arg0, %c0_i32 : i32, i32
  }
  func.func @transform_1(%arg0: i32) -> (i32, i32) {
    %c0_i32 = arith.constant 0 : i32
    %c0_i32_0 = arith.constant 0 : i32
    %c0_i32_1 = arith.constant 0 : i32
    return %c0_i32, %c0_i32_0 : i32, i32
  }
  func.func @transform_2(%arg0: i32) -> (i32, i32) {
    %c0_i32 = arith.constant 0 : i32
    %c0_i32_0 = arith.constant 0 : i32
    %c0_i32_1 = arith.constant 0 : i32
    return %c0_i32, %c0_i32_0 : i32, i32
  }
  func.func @transform_3(%arg0: i32) -> (i32, i32) {
    %c0_i32 = arith.constant 0 : i32
    %c0_i32_0 = arith.constant 0 : i32
    %c0_i32_1 = arith.constant 0 : i32
    return %c0_i32, %c0_i32_0 : i32, i32
  }
  func.func @transform_4(%arg0: i32) -> (i32, i32) {
    %c0_i32 = arith.constant 0 : i32
    %c0_i32_0 = arith.constant 0 : i32
    %c0_i32_1 = arith.constant 0 : i32
    return %c0_i32, %c0_i32_0 : i32, i32
  }
  func.func @transform_5(%arg0: i32) -> (i32, i32) {
    %c0_i32 = arith.constant 0 : i32
    %c0_i32_0 = arith.constant 0 : i32
    %c0_i32_1 = arith.constant 0 : i32
    return %c0_i32, %c0_i32_0 : i32, i32
  }
  func.func @transform_6(%arg0: i32) -> (i32, i32) {
    %c0_i32 = arith.constant 0 : i32
    %c0_i32_0 = arith.constant 0 : i32
    %c0_i32_1 = arith.constant 0 : i32
    return %c0_i32, %c0_i32_0 : i32, i32
  }
  func.func @transform_7(%arg0: i32) -> (i32, i32) {
    %c0_i32 = arith.constant 0 : i32
    %c0_i32_0 = arith.constant 0 : i32
    return %arg0, %c0_i32 : i32, i32
  }
}

</mosaic_0001>

<bundles_post_ra>
// kernel: net_forward.3
= control target key start
LH: loop header
LB: loop body
LE: loop exit
PB: predicated region body
PF: predicated region fallthrough
CT: control target
= control target key end

     0   :  { %s921_s12 = smov 0   ;;  %s923_s13 = smov 0   ;;  %s1124_s0 = inlined_call_operand.vmem [shape: bf16[8,75], index: 0, kind: input, shape index: {}]   ;;  %s1125_s1 = inlined_call_operand.vmem [shape: f32[8,1], index: 1, kind: input, shape index: {}]   ;;  %s1126_s2 = inlined_call_operand.vmem [shape: bf16[75,2048], index: 2, kind: input, shape index: {}]   ;;  %s1127_s3 = inlined_call_operand.vmem [shape: bf16[8,512], index: 3, kind: output, shape index: {}]  }
   0x1   :  { %s925_s14 = smov 0  }
   0x2 LB: > { %s788_s15 = sadd.s32 4294967295, %s897_s14   ;;  %s938_s16 = sadd.s32 1, %s897_s14   ;;  %s897_s14 = sphi %s925_s14, %s1130_s14   ;;  %s893_s13 = sphi %s923_s13, %s1129_s13   ;;  %s889_s12 = sphi %s921_s12, %s1128_s12  }
   0x3   : > { %s59_s17 = ssub.s32 %s897_s14, %s938_s16  ;;  %s62_s18 = sadd.s32 1, %s893_s13 }
   0x4   : > { %p60_p0 = scmp.eq.s32.totalorder %s59_s17, 0  ;;  %p69_p1 = scmp.ne.s32.totalorder %s893_s13, %s889_s12 }
   0x5   : > { %p70_p2 = scmp.eq.s32.totalorder %s897_s14, 0  ;;  %p791_p4 = scmp.ge.s32.totalorder %s897_s14, 2 }
   0x6   : > { %s947_s19 = scalar_select %p60_p0, %s893_s13, %s62_s18  }
   0x7   : > { %p71_p3 = por %p70_p2, %p69_p1  ;;  %127 = sbr.rel (%p791_p4) target bundleno = 37 (0x25), region = 24 }
   0xc   : > { %130 = sbr.rel (!%p71_p3) target bundleno = 37 (0x25), region = 28  ;;  %s132_s20 = sand.u32 (%p71_p3), 1, %s893_s13  }
   0xd   : > { %s844_s21 = sshll.u32 (%p71_p3), %s897_s14, 5  ;;  %s846_s22 = smul.u32 (%p71_p3), 320, %s132_s20 }
   0xe   : > { %s955_s25 = scalar_lea.vmem (%p71_p3), %s1126_s2, %s844_s21 }
   0xf   : > { %v150_v0 = vld [vmem:[%s955_s25] sm:$0xff] (%p71_p3)  ;;  %v152_v1 = vld [vmem:[%s955_s25 + $0x8] sm:$0xff] (%p71_p3)  ;;  %v154_v2 = vld [vmem:[%s955_s25 + $0x10] sm:$0xff] (%p71_p3)  ;;  %s963_s26 = scalar_lea.vmem (%p71_p3), [#allocation2], %s846_s22 }
  0x10   : > { %v156_v3 = vld [vmem:[%s955_s25 + $0x18] sm:$0xff] (%p71_p3)  ;;  %v158_v4 = vld [vmem:[%s955_s25 + $0x40] sm:$0xff] (%p71_p3)  ;;  %v160_v5 = vld [vmem:[%s955_s25 + $0x48] sm:$0xff] (%p71_p3)  ;;  %151 = vst [vmem:[%s963_s26] sm:$0xff] (%p71_p3), %v150_v0 }
  0x11   : > { %153 = vst [vmem:[%s963_s26 + $0x8] sm:$0xff] %v152_v1  ;;  %155 = vst [vmem:[%s963_s26 + $0x10] sm:$0xff] %v154_v2  ;;  %v162_v6 = vld [vmem:[%s955_s25 + $0x50] sm:$0xff]  ;;  %v164_v7 = vld [vmem:[%s955_s25 + $0x58] sm:$0xff] }
  0x12   : > { %157 = vst [vmem:[%s963_s26 + $0x18] sm:$0xff] %v156_v3  ;;  %159 = vst [vmem:[%s963_s26 + $0x20] sm:$0xff] %v158_v4  ;;  %v166_v8 = vld [vmem:[%s955_s25 + $0x80] sm:$0xff]  ;;  %v168_v9 = vld [vmem:[%s955_s25 + $0x88] sm:$0xff] }
  0x13   : > { %161 = vst [vmem:[%s963_s26 + $0x28] sm:$0xff] %v160_v5  ;;  %163 = vst [vmem:[%s963_s26 + $0x30] sm:$0xff] %v162_v6  ;;  %v170_v10 = vld [vmem:[%s955_s25 + $0x90] sm:$0xff]  ;;  %v172_v11 = vld [vmem:[%s955_s25 + $0x98] sm:$0xff] }
  0x14   : > { %165 = vst [vmem:[%s963_s26 + $0x38] sm:$0xff] %v164_v7  ;;  %167 = vst [vmem:[%s963_s26 + $0x40] sm:$0xff] %v166_v8  ;;  %v174_v12 = vld [vmem:[%s955_s25 + $0xc0] sm:$0xff]  ;;  %v176_v13 = vld [vmem:[%s955_s25 + $0xc8] sm:$0xff] }
  0x15   : > { %169 = vst [vmem:[%s963_s26 + $0x48] sm:$0xff] %v168_v9  ;;  %171 = vst [vmem:[%s963_s26 + $0x50] sm:$0xff] %v170_v10  ;;  %v178_v14 = vld [vmem:[%s955_s25 + $0xd0] sm:$0xff]  ;;  %v180_v15 = vld [vmem:[%s955_s25 + $0xd8] sm:$0xff] }
  0x16   : > { %173 = vst [vmem:[%s963_s26 + $0x58] sm:$0xff] %v172_v11  ;;  %175 = vst [vmem:[%s963_s26 + $0x60] sm:$0xff] %v174_v12  ;;  %v182_v16 = vld [vmem:[%s955_s25 + $0x100] sm:$0xff]  ;;  %v184_v17 = vld [vmem:[%s955_s25 + $0x108] sm:$0xff] }
  0x17   : > { %177 = vst [vmem:[%s963_s26 + $0x68] sm:$0xff] %v176_v13  ;;  %179 = vst [vmem:[%s963_s26 + $0x70] sm:$0xff] %v178_v14  ;;  %v186_v18 = vld [vmem:[%s955_s25 + $0x110] sm:$0xff]  ;;  %v188_v19 = vld [vmem:[%s955_s25 + $0x118] sm:$0xff] }
  0x18   : > { %181 = vst [vmem:[%s963_s26 + $0x78] sm:$0xff] %v180_v15  ;;  %183 = vst [vmem:[%s963_s26 + $0x80] sm:$0xff] %v182_v16  ;;  %v190_v20 = vld [vmem:[%s955_s25 + $0x140] sm:$0xff]  ;;  %v192_v21 = vld [vmem:[%s955_s25 + $0x148] sm:$0xff] }
  0x19   : > { %185 = vst [vmem:[%s963_s26 + $0x88] sm:$0xff] %v184_v17  ;;  %187 = vst [vmem:[%s963_s26 + $0x90] sm:$0xff] %v186_v18  ;;  %v194_v22 = vld [vmem:[%s955_s25 + $0x150] sm:$0xff]  ;;  %v196_v23 = vld [vmem:[%s955_s25 + $0x158] sm:$0xff] }
  0x1a   : > { %189 = vst [vmem:[%s963_s26 + $0x98] sm:$0xff] %v188_v19  ;;  %191 = vst [vmem:[%s963_s26 + $0xa0] sm:$0xff] %v190_v20  ;;  %v198_v24 = vld [vmem:[%s955_s25 + $0x180] sm:$0xff]  ;;  %v200_v25 = vld [vmem:[%s955_s25 + $0x188] sm:$0xff] }
  0x1b   : > { %193 = vst [vmem:[%s963_s26 + $0xa8] sm:$0xff] %v192_v21  ;;  %195 = vst [vmem:[%s963_s26 + $0xb0] sm:$0xff] %v194_v22  ;;  %v202_v26 = vld [vmem:[%s955_s25 + $0x190] sm:$0xff]  ;;  %v204_v27 = vld [vmem:[%s955_s25 + $0x198] sm:$0xff] }
  0x1c   : > { %197 = vst [vmem:[%s963_s26 + $0xb8] sm:$0xff] %v196_v23  ;;  %199 = vst [vmem:[%s963_s26 + $0xc0] sm:$0xff] %v198_v24  ;;  %v206_v28 = vld [vmem:[%s955_s25 + $0x1c0] sm:$0xff]  ;;  %v208_v29 = vld [vmem:[%s955_s25 + $0x1c8] sm:$0xff] }
  0x1d   : > { %201 = vst [vmem:[%s963_s26 + $0xc8] sm:$0xff] %v200_v25  ;;  %203 = vst [vmem:[%s963_s26 + $0xd0] sm:$0xff] %v202_v26  ;;  %v210_v30 = vld [vmem:[%s955_s25 + $0x1d0] sm:$0xff]  ;;  %v212_v31 = vld [vmem:[%s955_s25 + $0x1d8] sm:$0xff] }
  0x1e   : > { %205 = vst [vmem:[%s963_s26 + $0xd8] sm:$0xff] %v204_v27  ;;  %207 = vst [vmem:[%s963_s26 + $0xe0] sm:$0xff] %v206_v28  ;;  %v214_v32 = vld [vmem:[%s955_s25 + $0x200] sm:$0xff]  ;;  %v216_v33 = vld [vmem:[%s955_s25 + $0x208] sm:$0xff] }
  0x1f   : > { %209 = vst [vmem:[%s963_s26 + $0xe8] sm:$0xff] %v208_v29  ;;  %211 = vst [vmem:[%s963_s26 + $0xf0] sm:$0xff] %v210_v30  ;;  %v218_v34 = vld [vmem:[%s955_s25 + $0x210] sm:$0xff]  ;;  %v220_v35 = vld [vmem:[%s955_s25 + $0x218] sm:$0xff] }
  0x20   : > { %213 = vst [vmem:[%s963_s26 + $0xf8] sm:$0xff] %v212_v31  ;;  %215 = vst [vmem:[%s963_s26 + $0x100] sm:$0xff] %v214_v32  ;;  %v222_v36 = vld [vmem:[%s955_s25 + $0x240] sm:$0xff]  ;;  %v224_v37 = vld [vmem:[%s955_s25 + $0x248] sm:$0xff] }
  0x21   : > { %217 = vst [vmem:[%s963_s26 + $0x108] sm:$0xff] %v216_v33  ;;  %219 = vst [vmem:[%s963_s26 + $0x110] sm:$0xff] %v218_v34  ;;  %v226_v38 = vld [vmem:[%s955_s25 + $0x250] sm:$0xff]  ;;  %v228_v39 = vld [vmem:[%s955_s25 + $0x258] sm:$0xff] }
  0x22   : > { %221 = vst [vmem:[%s963_s26 + $0x118] sm:$0xff] %v220_v35  ;;  %223 = vst [vmem:[%s963_s26 + $0x120] sm:$0xff] %v222_v36 }
  0x23   : > { %225 = vst [vmem:[%s963_s26 + $0x128] sm:$0xff] %v224_v37  ;;  %227 = vst [vmem:[%s963_s26 + $0x130] sm:$0xff] %v226_v38 }
  0x24   : > { %229 = vst [vmem:[%s963_s26 + $0x138] sm:$0xff] %v228_v39 }
  0x25 PF: > { %p794_p5 = scmp.ge.s32.totalorder %s897_s14, 1  ;;  %p234_p6 = scmp.lt.s32.totalorder %s897_s14, 3 }
  0x27   : > { %p235_p7 = pnand %p794_p5, %p234_p6 }
  0x28   : > { %s241_s27 = sand.u32 (!%p235_p7), 1, %s889_s12   ;;  %s795_s7 = sshll.u32 (!%p235_p7), %s788_s15, 1 }
  0x29   : > { %238 = sbr.rel (%p235_p7) target bundleno = 299 (0x12b), region = 51  ;;  %p266_p8 = scmp.lt.s32.totalorder (!%p235_p7), %s795_s7, 3 }
  0x2a   : > { %s847_s30 = smul.u32 (!%p235_p7), 320, %s241_s27 }
  0x2c   : > { %s1048_s4 = scalar_lea.vmem (!%p235_p7), [#allocation2], %s847_s30 }
  0x2e   : > { %vm509_vm0 = vcmask 1044480   ;;  %v707_v40 = vld [vmem:[%s1125_s1] sm:$0xff]  ;;  %vm510_vm1 = vcmask 1045504   ;;  %v899_v41 = vmov 65535   ;;  %v900_v43 = vmov 0   ;;  %v306_v47 = vld [vmem:[%s1048_s4 + $0x108] sm:$0xff] }
  0x2f   : > { %v511_v42 = vsel %vm509_vm0, 4294967295, %v899_v41  ;;  %569 = vmatprep.mubr.bf16.mxu0 %v900_v43  ;;  %610 = vmatprep.mubr.bf16.mxu1 %v900_v43  ;;  %v305_v44 = vld [vmem:[%s1048_s4 + $0x100] sm:$0xff]  ;;  %v310_v49 = vld [vmem:[%s1048_s4 + $0x128] sm:$0x33]  ;;  %v307_v18 = vld [vmem:[%s1048_s4 + $0x110] sm:$0xff]  ;;  %vm505_vm2 = vcmask 613376  }
  0x30   : > { %874 = vset.pattern.permute.xlu0 %v900_v43  ;;  %v309_v45 = vld [vmem:[%s1048_s4 + $0x120] sm:$0x33]  ;;  %v1052_v46 = vsel %vm510_vm1, %v511_v42, 0  ;;  %v832_v53 = vcombine.high %v306_v47, %v310_v49  ;;  %v831_v54 = vcombine.low %v306_v47, %v310_v49  ;;  %v298_v55 = vld [vmem:[%s1048_s4 + $0xc8] sm:$0xff]  ;;  %v311_v19 = vld [vmem:[%s1048_s4 + $0x130] sm:$0x33] }
  0x31   : > { %710 = vperm.xlu0 %874, %v707_v40   ;;  %v830_v48 = vcombine.high %v305_v44, %v309_v45  ;;  %v829_v50 = vcombine.low %v305_v44, %v309_v45  ;;  %v297_v51 = vld [vmem:[%s1048_s4 + $0xc0] sm:$0xff]  ;;  %v302_v56 = vld [vmem:[%s1048_s4 + $0xe8] sm:$0xff]  ;;  %v308_v21 = vld [vmem:[%s1048_s4 + $0x118] sm:$0xff]  ;;  %v834_v26 = vcombine.high %v307_v18, %v311_v19  ;;  %v833_v30 = vcombine.low %v307_v18, %v311_v19  ;;  %s1132_s7 = smov (!%p266_p8, %s795_s7), 3 }
  0x32   : > { %v301_v52 = vld [vmem:[%s1048_s4 + $0xe0] sm:$0xff]  ;;  %v523_v60 = vand.u32 %v832_v53, %v1052_v46  ;;  %v520_v61 = vand.u32 %v831_v54, %v1052_v46  ;;  %v824_v62 = vcombine.high %v298_v55, %v302_v56  ;;  %v290_v1 = vld [vmem:[%s1048_s4 + $0x88] sm:$0xff]  ;;  %v823_v4 = vcombine.low %v298_v55, %v302_v56  ;;  %v312_v22 = vld [vmem:[%s1048_s4 + $0x138] sm:$0x33]  ;;  %s796_s8 = sshll.u32 %s1132_s7, 2 }
  0x33   : > { %v517_v57 = vand.u32 %v830_v48, %v1052_v46  ;;  %v514_v58 = vand.u32 %v829_v50, %v1052_v46  ;;  %v822_v59 = vcombine.high %v297_v51, %v301_v52  ;;  %v289_v63 = vld [vmem:[%s1048_s4 + $0x80] sm:$0xff]  ;;  %v294_v2 = vld [vmem:[%s1048_s4 + $0xa8] sm:$0xff]  ;;  %v821_v3 = vcombine.low %v297_v51, %v301_v52  ;;  %v299_v35 = vld [vmem:[%s1048_s4 + $0xd0] sm:$0xff]  ;;  %s269_s11 = scalar_lea.vmem %s1127_s3, %s796_s8 }
  0x34   : > { %v293_v0 = vld [vmem:[%s1048_s4 + $0xa0] sm:$0xff]  ;;  %584 = vmatprep.subr.bf16.mxu1 %v523_v60  ;;  %v816_v6 = vcombine.high %v290_v1, %v294_v2  ;;  %v282_v9 = vld [vmem:[%s1048_s4 + $0x48] sm:$0xff]  ;;  %v815_v12 = vcombine.low %v290_v1, %v294_v2  ;;  %v836_v28 = vcombine.high %v308_v21, %v312_v22  ;;  %v529_v32 = vand.u32 %v834_v26, %v1052_v46  ;;  %v303_v36 = vld [vmem:[%s1048_s4 + $0xf0] sm:$0xff] }
  0x35   : > { %543 = vmatprep.subr.bf16.mxu0 %v517_v57  ;;  %585 = vmatpush1.bf16.msra.mxu1 %v520_v61  ;;  %v814_v5 = vcombine.high %v289_v63, %v293_v0  ;;  %v281_v7 = vld [vmem:[%s1048_s4 + $0x40] sm:$0xff]  ;;  %v286_v10 = vld [vmem:[%s1048_s4 + $0x68] sm:$0xff]  ;;  %v813_v11 = vcombine.low %v289_v63, %v293_v0  ;;  %v835_v33 = vcombine.low %v308_v21, %v312_v22  ;;  %v300_v37 = vld [vmem:[%s1048_s4 + $0xd8] sm:$0xff] }
  0x36   : > { %544 = vmatpush1.bf16.msra.mxu0 %v514_v58  ;;  %586 = vmatprep.subr.bf16.mxu1 %v824_v62  ;;  %v285_v8 = vld [vmem:[%s1048_s4 + $0x60] sm:$0xff]  ;;  %v808_v16 = vcombine.high %v282_v9, %v286_v10  ;;  %v274_v17 = vld [vmem:[%s1048_s4 + $0x8] sm:$0xff]  ;;  %v807_v24 = vcombine.low %v282_v9, %v286_v10  ;;  %v535_v34 = vand.u32 %v836_v28, %v1052_v46  ;;  %v304_v38 = vld [vmem:[%s1048_s4 + $0xf8] sm:$0xff] }
  0x37   : > { %545 = vmatprep.subr.bf16.mxu0 %v822_v59  ;;  %v806_v13 = vcombine.high %v281_v7, %v285_v8  ;;  %v273_v14 = vld [vmem:[%s1048_s4] sm:$0xff]  ;;  %v278_v20 = vld [vmem:[%s1048_s4 + $0x28] sm:$0xff]  ;;  %v805_v23 = vcombine.low %v281_v7, %v285_v8  ;;  %v526_v40 = vand.u32 %v833_v30, %v1052_v46  ;;  %v532_v41 = vand.u32 %v835_v33, %v1052_v46  ;;  %v291_v45 = vld [vmem:[%s1048_s4 + $0x90] sm:$0xff] }
  0x38   : > { %v277_v15 = vld [vmem:[%s1048_s4 + $0x20] sm:$0xff]  ;;  %v800_v27 = vcombine.high %v274_v17, %v278_v20  ;;  %v799_v31 = vcombine.low %v274_v17, %v278_v20  ;;  %v826_v42 = vcombine.high %v299_v35, %v303_v36  ;;  %v828_v44 = vcombine.high %v300_v37, %v304_v38  ;;  %v295_v47 = vld [vmem:[%s1048_s4 + $0xb0] sm:$0xff]  ;;  %v292_v48 = vld [vmem:[%s1048_s4 + $0x98] sm:$0xff] }
  0x39   : > { %587 = vmatpush1.bf16.msra.mxu1 %v823_v4  ;;  %v798_v25 = vcombine.high %v273_v14, %v277_v15  ;;  %v797_v29 = vcombine.low %v273_v14, %v277_v15  ;;  %v272_v39 = vld [vmem:[%s1124_s0] sm:$0xf]  ;;  %v296_v49 = vld [vmem:[%s1048_s4 + $0xb8] sm:$0xff]  ;;  %v825_v50 = vcombine.low %v299_v35, %v303_v36  ;;  %v827_v46 = vcombine.low %v300_v37, %v304_v38  ;;  %v283_v53 = vld [vmem:[%s1048_s4 + $0x50] sm:$0xff] }
  0x3a   : > { %546 = vmatpush1.bf16.msra.mxu0 %v821_v3  ;;  %588 = vmatprep.subr.bf16.mxu1 %v816_v6  ;;  %v818_v51 = vcombine.high %v291_v45, %v295_v47  ;;  %v820_v52 = vcombine.high %v292_v48, %v296_v49  ;;  %v287_v54 = vld [vmem:[%s1048_s4 + $0x70] sm:$0xff]  ;;  %v284_v55 = vld [vmem:[%s1048_s4 + $0x58] sm:$0xff]  ;;  %v817_v57 = vcombine.low %v291_v45, %v295_v47 }
  0x3b   : > { %547 = vmatprep.subr.bf16.mxu0 %v814_v5  ;;  %v288_v56 = vld [vmem:[%s1048_s4 + $0x78] sm:$0xff]  ;;  %v819_v58 = vcombine.low %v292_v48, %v296_v49  ;;  %v810_v59 = vcombine.high %v283_v53, %v287_v54  ;;  %v275_v61 = vld [vmem:[%s1048_s4 + $0x10] sm:$0xff]  ;;  %v809_v1 = vcombine.low %v283_v53, %v287_v54 }
  0x3c   : > { %v812_v60 = vcombine.high %v284_v55, %v288_v56  ;;  %v279_v62 = vld [vmem:[%s1048_s4 + $0x30] sm:$0xff]  ;;  %v276_v63 = vld [vmem:[%s1048_s4 + $0x18] sm:$0xff]  ;;  %v811_v2 = vcombine.low %v284_v55, %v288_v56 }
  0x3d   : > { %589 = vmatpush1.bf16.msra.mxu1 %v815_v12  ;;  %v280_v0 = vld [vmem:[%s1048_s4 + $0x38] sm:$0xff]  ;;  %v802_v3 = vcombine.high %v275_v61, %v279_v62  ;;  %v801_v4 = vcombine.low %v275_v61, %v279_v62 }
  0x3e   : > { %548 = vmatpush1.bf16.msra.mxu0 %v813_v11  ;;  %590 = vmatprep.subr.bf16.mxu1 %v808_v16  ;;  %v803_v5 = vcombine.low %v276_v63, %v280_v0 }
  0x3f   : > { %549 = vmatprep.subr.bf16.mxu0 %v806_v13 }
  0x41   : > { %591 = vmatpush1.bf16.msra.mxu1 %v807_v24 }
  0x42   : > { %550 = vmatpush1.bf16.msra.mxu0 %v805_v23  ;;  %592 = vmatprep.subr.bf16.mxu1 %v800_v27 }
  0x43   : > { %551 = vmatprep.subr.bf16.mxu0 %v798_v25 }
  0x45   : > { %593 = vmatpush1.bf16.msra.mxu1 %v799_v31 }
  0x46   : > { %552 = vmatpush1.bf16.msra.mxu0 %v797_v29  ;;  %666 = vmatprep.subr.bf16.mxu1 %v535_v34 }
  0x47   : > { %625 = vmatprep.subr.bf16.mxu0 %v529_v32 }
  0x48   : > { %838 = vmatmul.mubr.msk.bf16.vlgmr.msra.gmra.mxu1 %vm505_vm2, %v272_v39 }
  0x49   : > { %837 = vmatmul.mubr.msk.bf16.vlgmr.msra.gmra.mxu0 %vm505_vm2, %v272_v39  ;;  %667 = vmatpush1.bf16.msra.mxu1 %v532_v41 }
  0x4a   : > { %626 = vmatpush1.bf16.msra.mxu0 %v526_v40  ;;  %668 = vmatprep.subr.bf16.mxu1 %v828_v44 }
  0x4b   : > { %627 = vmatprep.subr.bf16.mxu0 %v826_v42  ;;  %651 = vmatprep.mubr.bf16.mxu0 %v900_v43 }
  0x4c   : > { %692 = vmatprep.mubr.bf16.mxu1 %v900_v43  ;;  %v804_v43 = vcombine.high %v276_v63, %v280_v0 }
  0x4d   : > { %669 = vmatpush1.bf16.msra.mxu1 %v827_v46 }
  0x4e   : > { %628 = vmatpush1.bf16.msra.mxu0 %v825_v50  ;;  %670 = vmatprep.subr.bf16.mxu1 %v820_v52 }
  0x4f   : > { %629 = vmatprep.subr.bf16.mxu0 %v818_v51 }
  0x51   : > { %671 = vmatpush1.bf16.msra.mxu1 %v819_v58 }
  0x52   : > { %630 = vmatpush1.bf16.msra.mxu0 %v817_v57  ;;  %672 = vmatprep.subr.bf16.mxu1 %v812_v60 }
  0x53   : > { %631 = vmatprep.subr.bf16.mxu0 %v810_v59 }
  0x55   : > { %673 = vmatpush1.bf16.msra.mxu1 %v811_v2 }
  0x56   : > { %632 = vmatpush1.bf16.msra.mxu0 %v809_v1  ;;  %674 = vmatprep.subr.bf16.mxu1 %v804_v43 }
  0x57   : > { %633 = vmatprep.subr.bf16.mxu0 %v802_v3 }
  0x59   : > { %675 = vmatpush1.bf16.msra.mxu1 %v803_v5 }
  0x5a   : > { %634 = vmatpush1.bf16.msra.mxu0 %v801_v4 }
  0x5c   : > { %840 = vmatmul.mubr.msk.bf16.vlgmr.msra.gmra.mxu1 %vm505_vm2, %v272_v39 }
  0x5d   : > { %839 = vmatmul.mubr.msk.bf16.vlgmr.msra.gmra.mxu0 %vm505_vm2, %v272_v39 }
  0xac   : > { %v711_v20 = vpop.permute.xlu0 %710 }
 0x108   : > { %v612_v7 = vpop.f32.mrf.mxu1 }
 0x109   : > { %v571_v6 = vpop.f32.mrf.mxu0 }
 0x10a   : > { %v614_v9 = vpop.f32.mrf.mxu1  ;;  %v701_v16 = vmax.f32 %v571_v6, %v612_v7 }
 0x10b   : > { %v573_v8 = vpop.f32.mrf.mxu0 }
 0x10c   : > { %v616_v11 = vpop.f32.mrf.mxu1  ;;  %v702_v21 = vmax.f32 %v573_v8, %v614_v9 }
 0x10d   : > { %v575_v10 = vpop.f32.mrf.mxu0 }
 0x10e   : > { %v617_v13 = vpop.f32.mrf.mxu1 }
 0x10f   : > { %v576_v12 = vpop.f32.mrf.mxu0 }
 0x11c   : > { %v694_v15 = vpop.f32.mrf.mxu1 }
 0x11d   : > { %v653_v14 = vpop.f32.mrf.mxu0 }
 0x11e   : > { %v703_v17 = vmax.f32 %v653_v14, %v694_v15  ;;  %v696_v19 = vpop.f32.mrf.mxu1 }
 0x11f   : > { %v655_v18 = vpop.f32.mrf.mxu0 }
 0x120   : > { %v704_v22 = vmax.f32 %v655_v18, %v696_v19  ;;  %v705_v23 = vmax.f32 %v701_v16, %v703_v17  ;;  %v698_v25 = vpop.f32.mrf.mxu1 }
 0x121   : > { %v657_v24 = vpop.f32.mrf.mxu0 }
 0x122   : > { %v706_v26 = vmax.f32 %v702_v21, %v704_v22  ;;  %v713_v27 = vadd.f32 %v711_v20, %v705_v23  ;;  %v699_v29 = vpop.f32.mrf.mxu1 }
 0x123   : > { %v658_v28 = vpop.f32.mrf.mxu0 }
 0x124   : > { %v714_v30 = vadd.f32 %v711_v20, %v706_v26  ;;  %v715_v31 = vmax.f32 %v713_v27, 0.0 }
 0x126   : > { %v716_v32 = vmax.f32 %v714_v30, 0.0 }
 0x128   : > { %v845_v33 = vpack.c.bf16 %v716_v32, %v715_v31 }
 0x12a   : > { %725 = vst [vmem:[%s269_s11] sm:$0xff] %v845_v33 }
 0x12b PF: > { %p10_p9 = scmp.ge.s32.totalorder %s938_s16, 4   ;;  %s1128_s12 = smov %s893_s13 }
 0x12c   : > { %s1129_s13 = smov %s947_s19  ;;  %s1130_s14 = smov %s938_s16 }
 0x12d   :  { %12 = sbr.rel (!%p10_p9) target bundleno = 2 (0x2), region = 90 }

// kernel: net_forward.4
= control target key start
LH: loop header
LB: loop body
LE: loop exit
PB: predicated region body
PF: predicated region fallthrough
CT: control target
= control target key end

     0   :  { %v613_v1 = vmov 0   ;;  %vm330_vm0 = vcmask 1043456   ;;  %vm326_vm1 = vcmask 588800   ;;  %s799_s2 = inlined_call_operand.vmem [shape: bf16[200,512], index: 2, kind: input, shape index: {}]   ;;  %s800_s0 = inlined_call_operand.vmem [shape: bf16[16,200], index: 0, kind: input, shape index: {}]   ;;  %s801_s1 = inlined_call_operand.vmem [shape: f32[16,1], index: 1, kind: input, shape index: {}]   ;;  %s802_s3 = inlined_call_operand.vmem [shape: bf16[16,128], index: 3, kind: output, shape index: {}]  }
   0x1   :  { %v534_v0 = vld [vmem:[%s799_s2 + $0xe4] ss:$16 sps:$4 sm:$0xff]   ;;  %533 = vset.pattern.permute.xlu0 %v613_v1  ;;  %v536_v2 = vld [vmem:[%s799_s2 + $0xec] ss:$16 sps:$4 sm:$0xff]   ;;  %v538_v3 = vld [vmem:[%s799_s2 + $0xe0] ss:$16 sps:$4 sm:$0xff]  }
   0x2   :  { %343 = vmatprep.subr.bf16.mxu0 %v534_v0  ;;  %v539_v4 = vld [vmem:[%s799_s2 + $0xe8] ss:$16 sps:$4 sm:$0xff]   ;;  %386 = vmatprep.subr.bf16.mxu1 %v536_v2  ;;  %v540_v5 = vld [vmem:[%s799_s2 + $0xc4] ss:$16 sps:$4 sm:$0xff]   ;;  %v542_v6 = vld [vmem:[%s799_s2 + $0xcc] ss:$16 sps:$4 sm:$0xff]  }
   0x3   :  { %344 = vmatpush1.bf16.msra.mxu0 %v538_v3  ;;  %387 = vmatpush1.bf16.msra.mxu1 %v539_v4  ;;  %v544_v7 = vld [vmem:[%s799_s2 + $0xc0] ss:$16 sps:$4 sm:$0xff]   ;;  %v545_v8 = vld [vmem:[%s799_s2 + $0xc8] ss:$16 sps:$4 sm:$0xff]   ;;  %v546_v9 = vld [vmem:[%s799_s2 + $0xa4] ss:$16 sps:$4 sm:$0xff]  }
   0x4   :  { %345 = vmatprep.subr.bf16.mxu0 %v540_v5  ;;  %388 = vmatprep.subr.bf16.mxu1 %v542_v6  ;;  %v548_v10 = vld [vmem:[%s799_s2 + $0xac] ss:$16 sps:$4 sm:$0xff]   ;;  %v550_v11 = vld [vmem:[%s799_s2 + $0xa0] ss:$16 sps:$4 sm:$0xff]   ;;  %v551_v12 = vld [vmem:[%s799_s2 + $0xa8] ss:$16 sps:$4 sm:$0xff]  }
   0x5   :  { %v552_v13 = vld [vmem:[%s799_s2 + $0x84] ss:$16 sps:$4 sm:$0xff]   ;;  %v554_v14 = vld [vmem:[%s799_s2 + $0x8c] ss:$16 sps:$4 sm:$0xff]   ;;  %v556_v15 = vld [vmem:[%s799_s2 + $0x80] ss:$16 sps:$4 sm:$0xff]  }
   0x6   :  { %v557_v16 = vld [vmem:[%s799_s2 + $0x88] ss:$16 sps:$4 sm:$0xff]   ;;  %v558_v17 = vld [vmem:[%s799_s2 + $0x64] ss:$16 sps:$4 sm:$0xff]   ;;  %v560_v18 = vld [vmem:[%s799_s2 + $0x6c] ss:$16 sps:$4 sm:$0xff]  }
   0x7   :  { %346 = vmatpush1.bf16.msra.mxu0 %v544_v7  ;;  %389 = vmatpush1.bf16.msra.mxu1 %v545_v8  ;;  %v562_v19 = vld [vmem:[%s799_s2 + $0x60] ss:$16 sps:$4 sm:$0xff]   ;;  %v563_v20 = vld [vmem:[%s799_s2 + $0x68] ss:$16 sps:$4 sm:$0xff]   ;;  %v564_v21 = vld [vmem:[%s799_s2 + $0x44] ss:$16 sps:$4 sm:$0xff]  }
   0x8   :  { %347 = vmatprep.subr.bf16.mxu0 %v546_v9  ;;  %390 = vmatprep.subr.bf16.mxu1 %v548_v10  ;;  %v566_v22 = vld [vmem:[%s799_s2 + $0x4c] ss:$16 sps:$4 sm:$0xff]   ;;  %v568_v23 = vld [vmem:[%s799_s2 + $0x40] ss:$16 sps:$4 sm:$0xff]   ;;  %v569_v24 = vld [vmem:[%s799_s2 + $0x48] ss:$16 sps:$4 sm:$0xff]  }
   0x9   :  { %v570_v25 = vld [vmem:[%s799_s2 + $0x24] ss:$16 sps:$4 sm:$0xff]   ;;  %v572_v26 = vld [vmem:[%s799_s2 + $0x2c] ss:$16 sps:$4 sm:$0xff]   ;;  %v574_v27 = vld [vmem:[%s799_s2 + $0x20] ss:$16 sps:$4 sm:$0xff]  }
   0xa   :  { %v575_v28 = vld [vmem:[%s799_s2 + $0x28] ss:$16 sps:$4 sm:$0xff]   ;;  %v576_v29 = vld [vmem:[%s799_s2 + $0x4] ss:$16 sps:$4 sm:$0xff]   ;;  %v578_v30 = vld [vmem:[%s799_s2 + $0xc] ss:$16 sps:$4 sm:$0xff]  }
   0xb   :  { %348 = vmatpush1.bf16.msra.mxu0 %v550_v11  ;;  %391 = vmatpush1.bf16.msra.mxu1 %v551_v12  ;;  %v65_v31 = vld [vmem:[%s799_s2 + $0x180] sm:$0xff]  ;;  %v66_v32 = vld [vmem:[%s799_s2 + $0x188] sm:$0xff] }
   0xc   :  { %349 = vmatprep.subr.bf16.mxu0 %v552_v13  ;;  %392 = vmatprep.subr.bf16.mxu1 %v554_v14  ;;  %v580_v33 = vld [vmem:[%s799_s2] ss:$16 sps:$4 sm:$0xff]   ;;  %v581_v34 = vld [vmem:[%s799_s2 + $0x8] ss:$16 sps:$4 sm:$0xff]   ;;  %v516_v35 = vcombine.high %v65_v31, %v65_v31  ;;  %v518_v36 = vcombine.high %v66_v32, %v66_v32  ;;  %v515_v37 = vcombine.low %v65_v31, %v65_v31  ;;  %v586_v39 = vld [vmem:[%s799_s2 + $0x164] ss:$16 sps:$4 sm:$0xff]  }
   0xd   :  { %v517_v38 = vcombine.low %v66_v32, %v66_v32  ;;  %v588_v42 = vld [vmem:[%s799_s2 + $0x16c] ss:$16 sps:$4 sm:$0xff]   ;;  %v435_v44 = vld [vmem:[%s801_s1] sm:$0xff]  ;;  %v591_v46 = vld [vmem:[%s799_s2 + $0x168] ss:$16 sps:$4 sm:$0xff]  }
   0xe   :  { %v332_v40 = vsel %vm330_vm0, %v515_v37, 0  ;;  %v612_v43 = vld [vmem:[%s800_s0 + $0x4] ss:$8 sps:$4 sm:$0xff]   ;;  %439 = vperm.xlu0 %533, %v435_v44   ;;  %v590_v45 = vld [vmem:[%s799_s2 + $0x160] ss:$16 sps:$4 sm:$0xff]  }
   0xf   :  { %350 = vmatpush1.bf16.msra.mxu0 %v556_v15  ;;  %393 = vmatpush1.bf16.msra.mxu1 %v557_v16  ;;  %v338_v41 = vsel %vm330_vm0, %v517_v38, 0  ;;  %v436_v47 = vld [vmem:[%s801_s1 + $0x8] sm:$0xff]  ;;  %v592_v48 = vld [vmem:[%s799_s2 + $0x144] ss:$16 sps:$4 sm:$0xff]   ;;  %v596_v50 = vld [vmem:[%s799_s2 + $0x140] ss:$16 sps:$4 sm:$0xff]  }
  0x10   :  { %351 = vmatprep.subr.bf16.mxu0 %v558_v17  ;;  %394 = vmatprep.subr.bf16.mxu1 %v560_v18  ;;  %v594_v49 = vld [vmem:[%s799_s2 + $0x14c] ss:$16 sps:$4 sm:$0xff]   ;;  %v597_v51 = vld [vmem:[%s799_s2 + $0x148] ss:$16 sps:$4 sm:$0xff]   ;;  %v598_v52 = vld [vmem:[%s799_s2 + $0x124] ss:$16 sps:$4 sm:$0xff]  }
  0x11   :  { %520 = vmatprep.mubr.msk.bf16.mxu0 %vm326_vm1, %v612_v43  ;;  %522 = vmatprep.mubr.msk.bf16.mxu1 %vm326_vm1, %v612_v43  ;;  %v600_v53 = vld [vmem:[%s799_s2 + $0x12c] ss:$16 sps:$4 sm:$0xff]   ;;  %v602_v54 = vld [vmem:[%s799_s2 + $0x120] ss:$16 sps:$4 sm:$0xff]   ;;  %v603_v55 = vld [vmem:[%s799_s2 + $0x128] ss:$16 sps:$4 sm:$0xff]  }
  0x12   :  { %444 = vperm.xlu0 %533, %v436_v47   ;;  %v604_v56 = vld [vmem:[%s799_s2 + $0x104] ss:$16 sps:$4 sm:$0xff]   ;;  %v606_v57 = vld [vmem:[%s799_s2 + $0x10c] ss:$16 sps:$4 sm:$0xff]   ;;  %v608_v58 = vld [vmem:[%s799_s2 + $0x100] ss:$16 sps:$4 sm:$0xff]  }
  0x13   :  { %352 = vmatpush1.bf16.msra.mxu0 %v562_v19  ;;  %395 = vmatpush1.bf16.msra.mxu1 %v563_v20  ;;  %v609_v59 = vld [vmem:[%s799_s2 + $0x108] ss:$16 sps:$4 sm:$0xff]  }
  0x14   :  { %353 = vmatprep.subr.bf16.mxu0 %v564_v21  ;;  %396 = vmatprep.subr.bf16.mxu1 %v566_v22  ;;  %v610_v60 = vld [vmem:[%s800_s0] ss:$8 sps:$4 sm:$0xff]  }
  0x17   :  { %354 = vmatpush1.bf16.msra.mxu0 %v568_v23  ;;  %397 = vmatpush1.bf16.msra.mxu1 %v569_v24 }
  0x18   :  { %355 = vmatprep.subr.bf16.mxu0 %v570_v25  ;;  %398 = vmatprep.subr.bf16.mxu1 %v572_v26 }
  0x1b   :  { %356 = vmatpush1.bf16.msra.mxu0 %v574_v27  ;;  %399 = vmatpush1.bf16.msra.mxu1 %v575_v28 }
  0x1c   :  { %357 = vmatprep.subr.bf16.mxu0 %v576_v29  ;;  %400 = vmatprep.subr.bf16.mxu1 %v578_v30 }
  0x1f   :  { %358 = vmatpush1.bf16.msra.mxu0 %v580_v33  ;;  %401 = vmatpush1.bf16.msra.mxu1 %v581_v34 }
  0x20   :  { %519 = vmatprep.subr.msk.bf16.mxu0 %vm330_vm0, %v516_v35  ;;  %521 = vmatprep.subr.msk.bf16.mxu1 %vm330_vm0, %v518_v36 }
  0x23   :  { %366 = vmatpush2.bf16.msra.mxu0 %v332_v40  ;;  %409 = vmatpush2.bf16.msra.mxu1 %v338_v41 }
  0x24   :  { %367 = vmatprep.subr.bf16.mxu0 %v586_v39  ;;  %410 = vmatprep.subr.bf16.mxu1 %v588_v42 }
  0x27   :  { %368 = vmatpush2.bf16.msra.mxu0 %v590_v45  ;;  %411 = vmatpush2.bf16.msra.mxu1 %v591_v46 }
  0x28   :  { %369 = vmatprep.subr.bf16.mxu0 %v592_v48  ;;  %412 = vmatprep.subr.bf16.mxu1 %v594_v49 }
  0x2b   :  { %370 = vmatpush2.bf16.msra.mxu0 %v596_v50  ;;  %413 = vmatpush2.bf16.msra.mxu1 %v597_v51 }
  0x2c   :  { %371 = vmatprep.subr.bf16.mxu0 %v598_v52  ;;  %414 = vmatprep.subr.bf16.mxu1 %v600_v53 }
  0x2f   :  { %372 = vmatpush2.bf16.msra.mxu0 %v602_v54  ;;  %415 = vmatpush2.bf16.msra.mxu1 %v603_v55 }
  0x30   :  { %373 = vmatprep.subr.bf16.mxu0 %v604_v56  ;;  %416 = vmatprep.subr.bf16.mxu1 %v606_v57 }
  0x33   :  { %374 = vmatpush2.bf16.msra.mxu0 %v608_v58  ;;  %417 = vmatpush2.bf16.msra.mxu1 %v609_v59 }
  0x36   :  { %376 = vmatmul.mubr.bf16.vlgmr.msra.gmra.mxu0 %v610_v60  ;;  %419 = vmatmul.mubr.bf16.vlgmr.msra.gmra.mxu1 %v610_v60 }
  0x89   :  { %v440_v1 = vpop.permute.xlu0 %439 }
  0x8d   :  { %v445_v13 = vpop.permute.xlu0 %444 }
  0xf6   :  { %v377_v61 = vpop.f32.mrf.mxu0  ;;  %v420_v62 = vpop.f32.mrf.mxu1 }
  0xf8   :  { %v379_v63 = vpop.f32.mrf.mxu0  ;;  %v422_v0 = vpop.f32.mrf.mxu1 }
  0xf9   :  { %v429_v2 = vmax.f32 %v377_v61, %v379_v63  ;;  %v431_v3 = vmax.f32 %v420_v62, %v422_v0 }
  0xfa   :  { %v381_v4 = vpop.f32.mrf.mxu0  ;;  %v424_v5 = vpop.f32.mrf.mxu1 }
  0xfb   :  { %v433_v6 = vmax.f32 %v429_v2, %v431_v3 }
  0xfc   :  { %v383_v7 = vpop.f32.mrf.mxu0  ;;  %v426_v8 = vpop.f32.mrf.mxu1 }
  0xfd   :  { %v430_v9 = vmax.f32 %v381_v4, %v383_v7  ;;  %v432_v10 = vmax.f32 %v424_v5, %v426_v8  ;;  %v447_v11 = vadd.f32 %v440_v1, %v433_v6 }
  0xff   :  { %v434_v12 = vmax.f32 %v430_v9, %v432_v10  ;;  %v449_v15 = vmax.f32 %v447_v11, 0.0 }
 0x101   :  { %v448_v14 = vadd.f32 %v445_v13, %v434_v12 }
 0x103   :  { %v450_v16 = vmax.f32 %v448_v14, 0.0 }
 0x105   :  { %v530_v17 = vpack.c.bf16 %v450_v16, %v449_v15 }
 0x107   :  { %531 = vst [vmem:[%s802_s3] sm:$0xff] %v530_v17  }

// kernel: net_forward.5
= control target key start
LH: loop header
LB: loop body
LE: loop exit
PB: predicated region body
PF: predicated region fallthrough
CT: control target
= control target key end

     0   :  { %v741_v0 = vmov 0   ;;  %vm249_vm0 = vcmask 130048   ;;  %v742_v32 = vmov 0.0   ;;  %vm743_vm1 = vmmov 0   ;;  %s952_s1 = inlined_call_operand.vmem [shape: bf16[400,128], index: 1, kind: input, shape index: {}]   ;;  %s953_s0 = inlined_call_operand.vmem [shape: bf16[8,400], index: 0, kind: input, shape index: {}]   ;;  %s954_s3 = inlined_call_operand.vmem [shape: bf16[128,128], index: 3, kind: input, shape index: {}]   ;;  %s955_s5 = inlined_call_operand.vmem [shape: bf16[128,128], index: 5, kind: input, shape index: {}]   ;;  %s956_s2 = inlined_call_operand.vmem [shape: f32[1,128], index: 2, kind: input, shape index: {}]   ;;  %s957_s4 = inlined_call_operand.vmem [shape: f32[1,128], index: 4, kind: input, shape index: {}]   ;;  %s958_s6 = inlined_call_operand.vmem [shape: f32[1,128], index: 6, kind: input, shape index: {}]   ;;  %s959_s7 = inlined_call_operand.vmem [shape: f32[8,128], index: 7, kind: output, shape index: {}]  }
   0x1   :  { %293 = vmatprep.subr.bf16.mxu1 %v741_v0  ;;  %v696_v1 = vld [vmem:[%s952_s1 + $0x78] sm:$0xff]   ;;  %v699_v4 = vld [vmem:[%s952_s1 + $0x70] sm:$0xff]   ;;  %v702_v7 = vld [vmem:[%s952_s1 + $0x68] sm:$0xff]  }
   0x2   :  { %v697_v2 = vld [vmem:[%s952_s1 + $0xb8] sm:$0xff]   ;;  %613 = vmatprep.subr.bf16.mxu0 %v696_v1  ;;  %v700_v5 = vld [vmem:[%s952_s1 + $0xb0] sm:$0xff]   ;;  %v703_v8 = vld [vmem:[%s952_s1 + $0xa8] sm:$0xff]  }
   0x3   :  { %v698_v3 = vld [vmem:[%s952_s1 + $0x38] sm:$0xff]   ;;  %294 = vmatpush1.bf16.msra.mxu1 %v697_v2  ;;  %v701_v6 = vld [vmem:[%s952_s1 + $0x30] sm:$0xff]   ;;  %v704_v9 = vld [vmem:[%s952_s1 + $0x28] sm:$0xff]  }
   0x4   :  { %614 = vmatpush3.bf16.msra.mxu0 %v698_v3  ;;  %295 = vmatprep.subr.bf16.mxu1 %v741_v0  ;;  %v705_v10 = vld [vmem:[%s952_s1 + $0x60] sm:$0xff]   ;;  %v708_v13 = vld [vmem:[%s952_s1 + $0x58] sm:$0xff]   ;;  %v711_v16 = vld [vmem:[%s952_s1 + $0x50] sm:$0xff]  }
   0x5   :  { %615 = vmatprep.subr.bf16.mxu0 %v699_v4  ;;  %v706_v11 = vld [vmem:[%s952_s1 + $0xa0] sm:$0xff]   ;;  %v709_v14 = vld [vmem:[%s952_s1 + $0x98] sm:$0xff]   ;;  %v712_v17 = vld [vmem:[%s952_s1 + $0x90] sm:$0xff]  }
   0x6   :  { %v707_v12 = vld [vmem:[%s952_s1 + $0x20] sm:$0xff]   ;;  %v710_v15 = vld [vmem:[%s952_s1 + $0x18] sm:$0xff]   ;;  %v713_v18 = vld [vmem:[%s952_s1 + $0x10] sm:$0xff]  }
   0x7   :  { %296 = vmatpush1.bf16.msra.mxu1 %v700_v5  ;;  %v714_v19 = vld [vmem:[%s952_s1 + $0x48] sm:$0xff]   ;;  %v27_v22 = vld [vmem:[%s953_s0] sm:$0xff]  ;;  %v725_v31 = vld [vmem:[%s954_s3 + $0x38] sm:$0xff]  }
   0x8   :  { %616 = vmatpush3.bf16.msra.mxu0 %v701_v6  ;;  %297 = vmatprep.subr.bf16.mxu1 %v741_v0  ;;  %v715_v20 = vld [vmem:[%s952_s1 + $0x88] sm:$0xff]   ;;  %v717_v23 = vld [vmem:[%s952_s1 + $0x40] sm:$0xff]   ;;  %v566_v24 = vcombine.high %v27_v22, %v27_v22  ;;  %v565_v30 = vcombine.low %v27_v22, %v27_v22  ;;  %v726_v34 = vld [vmem:[%s954_s3 + $0x30] sm:$0xff]  }
   0x9   :  { %617 = vmatprep.subr.bf16.mxu0 %v702_v7  ;;  %v716_v21 = vld [vmem:[%s952_s1 + $0x8] sm:$0xff]   ;;  %v718_v27 = vld [vmem:[%s952_s1 + $0x80] sm:$0xff]   ;;  %v729_v37 = vld [vmem:[%s954_s3 + $0x18] sm:$0xff]  }
   0xa   :  { %v28_v25 = vld [vmem:[%s953_s0 + $0x8] sm:$0xff]  ;;  %285 = vmatprep.mubr.bf16.mxu0 %v566_v24  ;;  %v719_v28 = vld [vmem:[%s952_s1] sm:$0xff]   ;;  %v730_v38 = vld [vmem:[%s954_s3 + $0x10] sm:$0xff]  }
   0xb   :  { %298 = vmatpush1.bf16.msra.mxu1 %v703_v8  ;;  %v568_v26 = vcombine.high %v28_v25, %v28_v25  ;;  %v722_v29 = vld [vmem:[%s952_s1 + $0xc0] sm:$0xff]   ;;  %v567_v33 = vcombine.low %v28_v25, %v28_v25  ;;  %v727_v35 = vld [vmem:[%s954_s3 + $0x28] sm:$0xff]   ;;  %v733_v41 = vld [vmem:[%s955_s5 + $0x38] sm:$0xff]  }
   0xc   :  { %618 = vmatpush3.bf16.msra.mxu0 %v704_v9  ;;  %299 = vmatprep.subr.bf16.mxu1 %v741_v0  ;;  %v728_v36 = vld [vmem:[%s954_s3 + $0x20] sm:$0xff]   ;;  %v731_v39 = vld [vmem:[%s954_s3 + $0x8] sm:$0xff]   ;;  %v734_v42 = vld [vmem:[%s955_s5 + $0x30] sm:$0xff]  }
   0xd   :  { %619 = vmatprep.subr.bf16.mxu0 %v705_v10  ;;  %594 = vmatprep.mubr.msk.bf16.mxu1 %vm249_vm0, %v568_v26  ;;  %v732_v40 = vld [vmem:[%s954_s3] sm:$0xff]   ;;  %v735_v43 = vld [vmem:[%s955_s5 + $0x28] sm:$0xff]   ;;  %v737_v45 = vld [vmem:[%s955_s5 + $0x18] sm:$0xff]  }
   0xe   :  { %v736_v44 = vld [vmem:[%s955_s5 + $0x20] sm:$0xff]   ;;  %v738_v46 = vld [vmem:[%s955_s5 + $0x10] sm:$0xff]   ;;  %v739_v61 = vld [vmem:[%s955_s5 + $0x8] sm:$0xff]  }
   0xf   :  { %300 = vmatpush1.bf16.msra.mxu1 %v706_v11  ;;  %v564_v49 = vld [vmem:[%s956_s2] ss:$0 sm:$0xff] }
  0x10   :  { %620 = vmatpush3.bf16.msra.mxu0 %v707_v12  ;;  %301 = vmatprep.subr.bf16.mxu1 %v741_v0  ;;  %v740_v62 = vld [vmem:[%s955_s5] sm:$0xff]  }
  0x11   :  { %621 = vmatprep.subr.bf16.mxu0 %v708_v13  ;;  %v595_v63 = vld [vmem:[%s957_s4] ss:$0 sm:$0xff] }
  0x12   :  { %v604_v7 = vld [vmem:[%s958_s6] ss:$0 sm:$0xff] }
  0x13   :  { %302 = vmatpush1.bf16.msra.mxu1 %v709_v14 }
  0x14   :  { %622 = vmatpush3.bf16.msra.mxu0 %v710_v15  ;;  %303 = vmatprep.subr.bf16.mxu1 %v741_v0 }
  0x15   :  { %623 = vmatprep.subr.bf16.mxu0 %v711_v16 }
  0x17   :  { %304 = vmatpush1.bf16.msra.mxu1 %v712_v17 }
  0x18   :  { %624 = vmatpush3.bf16.msra.mxu0 %v713_v18  ;;  %305 = vmatprep.subr.bf16.mxu1 %v741_v0 }
  0x19   :  { %625 = vmatprep.subr.bf16.mxu0 %v714_v19 }
  0x1b   :  { %306 = vmatpush1.bf16.msra.mxu1 %v715_v20 }
  0x1c   :  { %626 = vmatpush3.bf16.msra.mxu0 %v716_v21  ;;  %307 = vmatprep.subr.bf16.mxu1 %v741_v0 }
  0x1d   :  { %627 = vmatprep.subr.bf16.mxu0 %v717_v23 }
  0x1f   :  { %308 = vmatpush1.bf16.msra.mxu1 %v718_v27 }
  0x20   :  { %628 = vmatpush3.bf16.msra.mxu0 %v719_v28  ;;  %323 = vmatprep.subr.bf16.mxu1 %v741_v0 }
  0x21   :  { %653 = vmatprep.subr.bf16.mxu0 %v742_v32 }
  0x23   :  { %286 = vmatmul.mubr.bf16.vlgmr.msra.gmra.mxu0 %v565_v30  ;;  %324 = vmatpush2.bf16.msra.mxu1 %v722_v29 }
  0x24   :  { %654 = vmatpush3.bf16.msra.mxu0 %v725_v31  ;;  %673 = vmatprep.subr.bf16.mxu1 %v742_v32 }
  0x25   :  { %655 = vmatprep.subr.bf16.mxu0 %v742_v32  ;;  %669 = vmatprep.mubr.msk.bf16.mxu0 %vm743_vm1, %v742_v32 }
  0x26   :  { %326 = vmatmul.mubr.bf16.vlgmr.msra.gmra.mxu1 %v567_v33 }
  0x27   :  { %689 = vmatprep.mubr.msk.bf16.mxu1 %vm743_vm1, %v742_v32  ;;  %674 = vmatpush3.bf16.msra.mxu1 %v733_v41 }
  0x28   :  { %656 = vmatpush3.bf16.msra.mxu0 %v726_v34  ;;  %675 = vmatprep.subr.bf16.mxu1 %v742_v32 }
  0x29   :  { %657 = vmatprep.subr.bf16.mxu0 %v742_v32 }
  0x2b   :  { %676 = vmatpush3.bf16.msra.mxu1 %v734_v42 }
  0x2c   :  { %658 = vmatpush3.bf16.msra.mxu0 %v727_v35  ;;  %677 = vmatprep.subr.bf16.mxu1 %v742_v32 }
  0x2d   :  { %659 = vmatprep.subr.bf16.mxu0 %v742_v32 }
  0x2f   :  { %678 = vmatpush3.bf16.msra.mxu1 %v735_v43 }
  0x30   :  { %660 = vmatpush3.bf16.msra.mxu0 %v728_v36  ;;  %679 = vmatprep.subr.bf16.mxu1 %v742_v32 }
  0x31   :  { %661 = vmatprep.subr.bf16.mxu0 %v742_v32 }
  0x33   :  { %680 = vmatpush3.bf16.msra.mxu1 %v736_v44 }
  0x34   :  { %662 = vmatpush3.bf16.msra.mxu0 %v729_v37  ;;  %681 = vmatprep.subr.bf16.mxu1 %v742_v32 }
  0x35   :  { %663 = vmatprep.subr.bf16.mxu0 %v742_v32 }
  0x37   :  { %682 = vmatpush3.bf16.msra.mxu1 %v737_v45 }
  0x38   :  { %664 = vmatpush3.bf16.msra.mxu0 %v730_v38  ;;  %683 = vmatprep.subr.bf16.mxu1 %v742_v32 }
  0x39   :  { %665 = vmatprep.subr.bf16.mxu0 %v742_v32 }
  0x3b   :  { %684 = vmatpush3.bf16.msra.mxu1 %v738_v46 }
  0x3c   :  { %666 = vmatpush3.bf16.msra.mxu0 %v731_v39  ;;  %685 = vmatprep.subr.bf16.mxu1 %v742_v32 }
  0x3d   :  { %667 = vmatprep.subr.bf16.mxu0 %v742_v32 }
  0x3f   :  { %686 = vmatpush3.bf16.msra.mxu1 %v739_v61 }
  0x40   :  { %668 = vmatpush3.bf16.msra.mxu0 %v732_v40  ;;  %687 = vmatprep.subr.bf16.mxu1 %v742_v32 }
  0x43   :  { %688 = vmatpush3.bf16.msra.mxu1 %v740_v62 }
  0xe3   :  { %v629_v47 = vpop.f32.mrf.mxu0 }
  0xe5   :  { %v630_v48 = vpop.f32.mrf.mxu0 }
  0xe6   :  { %v631_v50 = vadd.f32 %v630_v48, %v629_v47  ;;  %v327_v51 = vpop.f32.mrf.mxu1 }
  0xe7   :  { %v632_v52 = vpop.f32.mrf.mxu0 }
  0xe8   :  { %v288_v53 = vadd.f32 %v631_v50, %v564_v49  ;;  %v329_v54 = vpop.f32.mrf.mxu1 }
  0xe9   :  { %v633_v55 = vpop.f32.mrf.mxu0 }
  0xea   :  { %v328_v56 = vadd.f32 %v327_v51, %v288_v53  ;;  %v330_v57 = vpop.f32.mrf.mxu1 }
  0xec   :  { %v333_v58 = vmax.f32 %v328_v56, 0.0  ;;  %v331_v59 = vpop.f32.mrf.mxu1 }
  0xee   :  { %v334_v60 = vpack.c.bf16 %v333_v58, %v333_v58 }
  0xf0   :  { %670 = vmatmul.mubr.bf16.vlgmr.msra.gmra.mxu0 %v334_v60 }
 0x1b0   :  { %v440_v0 = vpop.f32.mrf.mxu0 }
 0x1b1   :  { %v441_v1 = vadd.f32 %v595_v63, %v440_v0 }
 0x1b2   :  { %v671_v2 = vpop.f32.mrf.mxu0 }
 0x1b3   :  { %v446_v3 = vmax.f32 %v441_v1, 0.0 }
 0x1b4   :  { %v443_v4 = vpop.f32.mrf.mxu0 }
 0x1b5   :  { %v447_v5 = vpack.c.bf16 %v446_v3, %v446_v3 }
 0x1b6   :  { %v672_v6 = vpop.f32.mrf.mxu0 }
 0x1b7   :  { %690 = vmatmul.mubr.bf16.vlgmr.msra.gmra.mxu1 %v447_v5 }
 0x277   :  { %v553_v8 = vpop.f32.mrf.mxu1 }
 0x278   :  { %v554_v9 = vadd.f32 %v604_v7, %v553_v8 }
 0x279   :  { %v691_v10 = vpop.f32.mrf.mxu1 }
 0x27a   :  { %559 = vst [vmem:[%s959_s7] sm:$0xff] %v554_v9 }
 0x27b   :  { %v556_v11 = vpop.f32.mrf.mxu1 }
 0x27d   :  { %v692_v12 = vpop.f32.mrf.mxu1 }

</bundles_post_ra>
